<compile_context>
chip_gen: v7x
topology: tpu7x:2x2x1
jax: 0.10.0
libtpu: 0.0.40
codegen_flags: <defaults>
</compile_context>

<pallas_src>
import jax
import jax.numpy as jnp
from jax.experimental import pallas as pl
from jax.experimental.pallas import tpu as pltpu

LANE = 128
SUBLANE = 8


def _round_up(n, m):
    return ((n + m - 1) // m) * m


def _cdiv(a, b):
    return -(-a // b)


def _qnet_kernel(x_ref, w1_ref, w2_ref, b_ref, o_ref):
    hp = w1_ref.shape[1]      # padded hidden width (static)
    outp = w2_ref.shape[1]    # padded output width (static)
    # hidden = relu(x @ W1 + b1)  -- MXU matmul, f32 accumulate
    h = jnp.dot(x_ref[...].astype(w1_ref.dtype), w1_ref[...],
                preferred_element_type=jnp.float32)
    h = jnp.maximum(h + b_ref[0:1, :hp], 0.0)          # bias row 0, VPU relu
    # out = hidden @ W2 + b2
    out = jnp.dot(h.astype(w2_ref.dtype), w2_ref[...],
                  preferred_element_type=jnp.float32)
    o_ref[...] = (out + b_ref[1:2, :outp]).astype(o_ref.dtype)


def pack_params(w1, b1, w2, b2, dtype=jnp.bfloat16):
    """One-time packing: pad lane-facing dims (hidden, OUT) to 128-multiples with zeros,
    cast weights to `dtype` (bf16 by default -> half the per-call weight DMA; MXU-native),
    and pack both biases into a single f32 (2, P) array."""
    IN, hidden = w1.shape
    OUT = w2.shape[1]
    hp = _round_up(hidden, LANE)
    outp = _round_up(OUT, LANE)
    bp = max(hp, outp)
    w1p = jnp.zeros((IN, hp), dtype).at[:, :hidden].set(w1.astype(dtype))
    w2p = jnp.zeros((hp, outp), dtype).at[:hidden, :OUT].set(w2.astype(dtype))
    bias = jnp.zeros((2, bp), jnp.float32)
    bias = bias.at[0, :hidden].set(b1.astype(jnp.float32))
    bias = bias.at[1, :OUT].set(b2.astype(jnp.float32))
    return w1p, w2p, bias


def _pick_tile(B, tile_b):
    """Choose (tile_b, nsteps) for B > tile_b: tile_b a multiple of 8, nsteps >= 2 and even
    (v7x megacore balance).  Odd step counts are rebalanced by shrinking tile_b."""
    tile_b = _round_up(tile_b, SUBLANE)
    nsteps = _cdiv(B, tile_b)
    if nsteps > 1 and nsteps % 2 == 1:
        target = nsteps + 1
        tile_b = _round_up(_cdiv(B, target), SUBLANE)
        nsteps = _cdiv(B, tile_b)
        if nsteps % 2 == 1:           # pathological rounding: just pad one extra zero tile
            nsteps += 1
    return tile_b, nsteps


def linear_qnet_forward(x, w1p, w2p, bias, *, out_features, tile_b=1024,
                        out_dtype=jnp.float32, return_padded=False):
    """x: (B, IN). w1p/w2p/bias from pack_params.
    Returns (B, out_features) in out_dtype, or the lane-padded (B, 128*k) output if
    return_padded=True (lets consumers index / argmax without a padded-buffer re-read)."""
    B, IN = x.shape
    hp = w1p.shape[1]
    outp = w2p.shape[1]
    vmem = pltpu.MemorySpace.VMEM

    if B <= tile_b:
        # Small-batch / inference path: no grid, whole arrays in VMEM, single invocation.
        out_padded = pl.pallas_call(
            _qnet_kernel,
            out_shape=jax.ShapeDtypeStruct((B, outp), out_dtype),
            in_specs=[pl.BlockSpec(memory_space=vmem)] * 4,
            out_specs=pl.BlockSpec(memory_space=vmem),
        )(x, w1p, w2p, bias)
    else:
        # Batched / training path: cdiv grid over the batch, marked "parallel" so it shards
        # across TensorCores on v7x; weight/bias blocks are revisited (single DMA).
        tb, nsteps = _pick_tile(B, tile_b)
        Bp = tb * nsteps
        if Bp != B:
            # One-time row pad (rows are independent; padded rows produce garbage we drop).
            x = jnp.zeros((Bp, IN), x.dtype).at[:B].set(x)
        out_padded = pl.pallas_call(
            _qnet_kernel,
            out_shape=jax.ShapeDtypeStruct((Bp, outp), out_dtype),
            grid=(nsteps,),
            in_specs=[
                pl.BlockSpec((tb, IN), lambda i: (i, 0)),
                pl.BlockSpec((IN, hp), lambda i: (0, 0)),
                pl.BlockSpec((hp, outp), lambda i: (0, 0)),
                pl.BlockSpec(bias.shape, lambda i: (0, 0)),
            ],
            out_specs=pl.BlockSpec((tb, outp), lambda i: (i, 0)),
            compiler_params=pltpu.CompilerParams(
                dimension_semantics=("parallel",)),
        )(x, w1p, w2p, bias)
        if Bp != B:
            out_padded = out_padded[:B]

    if return_padded:
        return out_padded
    # TODO(synk): for large-B consumers, prefer return_padded=True (or fuse argmax into the
    # kernel epilogue) to avoid re-reading the padded (B, 128) buffer just for OUT columns.
    return out_padded[:, :out_features]


def init_params(key, IN, hidden, OUT):
    """Deterministic init mimicking nn.Linear's uniform(-1/sqrt(fan_in), 1/sqrt(fan_in)).
    Weights stored already transposed to (in_features, out_features)."""
    k1, k2, k3, k4 = jax.random.split(key, 4)
    bound1 = 1.0 / jnp.sqrt(IN)
    bound2 = 1.0 / jnp.sqrt(hidden)
    w1 = jax.random.uniform(k1, (IN, hidden), jnp.float32, -bound1, bound1)
    b1 = jax.random.uniform(k2, (hidden,), jnp.float32, -bound1, bound1)
    w2 = jax.random.uniform(k3, (hidden, OUT), jnp.float32, -bound2, bound2)
    b2 = jax.random.uniform(k4, (OUT,), jnp.float32, -bound2, bound2)
    return w1, b1, w2, b2


if __name__ == "__main__":
    # Classic snake Q-net sizes: Linear(11, 32) -> ReLU -> Linear(32, 3).
    IN, HIDDEN, OUT = 11, 32, 3

    key = jax.random.PRNGKey(0)
    kx1, kx2, kx3, kp = jax.random.split(key, 4)
    w1, b1, w2, b2 = init_params(kp, IN, HIDDEN, OUT)

    def reference(x):
        return jnp.maximum(x @ w1 + b1, 0.0) @ w2 + b2

    # ---- Path 1: small batch, f32-packed weights, gridless -> exact vs reference.
    w1f, w2f, bf = pack_params(w1, b1, w2, b2, dtype=jnp.float32)
    x_small = jax.random.normal(kx1, (8, IN), jnp.float32)
    out_small = jax.block_until_ready(
        linear_qnet_forward(x_small, w1f, w2f, bf, out_features=OUT))
    assert out_small.shape == (8, OUT)
    assert jnp.allclose(out_small, reference(x_small), atol=1e-5, rtol=1e-5)

    # ---- Path 2: batched, f32-packed, B divisible -> 2 even "parallel" grid steps.
    x_mid = jax.random.normal(kx3, (2048, IN), jnp.float32)
    out_mid = jax.block_until_ready(
        linear_qnet_forward(x_mid, w1f, w2f, bf, out_features=OUT, tile_b=1024))
    assert out_mid.shape == (2048, OUT)
    assert jnp.allclose(out_mid, reference(x_mid), atol=1e-4, rtol=1e-4)

    # ---- Path 3: batched, bf16-packed (default) weights, non-divisible B -> cdiv grid with
    #      odd-step rebalance (3 -> 4 even steps of 576 rows).  Tolerance gated on bf16.
    w1b, w2b, bb = pack_params(w1, b1, w2, b2)  # bf16 default
    x_big = jax.random.normal(kx2, (2304, IN), jnp.float32)
    out_big = jax.block_until_ready(
        linear_qnet_forward(x_big, w1b, w2b, bb, out_features=OUT, tile_b=1024))
    assert out_big.shape == (2304, OUT)
    assert jnp.allclose(out_big, reference(x_big), atol=5e-2, rtol=5e-2)

    print("KERNEL_OK")
</pallas_src>

<mosaic_0001>
module attributes {stable_mosaic.version = 11 : i64} {
  func.func @_qnet_kernel(%arg0: memref<8x11xf32, #tpu.memory_space<vmem>>, %arg1: memref<11x128xf32, #tpu.memory_space<vmem>>, %arg2: memref<128x128xf32, #tpu.memory_space<vmem>>, %arg3: memref<2x128xf32, #tpu.memory_space<vmem>>, %arg4: memref<8x128xf32, #tpu.memory_space<vmem>>) attributes {dimension_semantics = [], scalar_prefetch = 0 : i64, scratch_operands = 0 : i64, tpu.core_type = #tpu.core_type<tc>} {
    %c0 = arith.constant 0 : index
    %c0_0 = arith.constant 0 : index
    %0 = vector.load %arg0[%c0, %c0_0] : memref<8x11xf32, #tpu.memory_space<vmem>>, vector<8x11xf32>
    %c0_1 = arith.constant 0 : index
    %c0_2 = arith.constant 0 : index
    %1 = vector.load %arg1[%c0_1, %c0_2] : memref<11x128xf32, #tpu.memory_space<vmem>>, vector<11x128xf32>
    %cst = arith.constant dense<0.000000e+00> : vector<8x128xf32>
    %2 = tpu.matmul %0, %1, %cst {dimension_numbers = #tpu.dot_dimension_numbers<[1], [0], [0], [1], [0, 0, 1, 1], [], []>} : vector<8x11xf32>, vector<11x128xf32>, vector<8x128xf32> -> vector<8x128xf32>
    %c0_3 = arith.constant 0 : index
    %c0_4 = arith.constant 0 : index
    %3 = vector.load %arg3[%c0_3, %c0_4] : memref<2x128xf32, #tpu.memory_space<vmem>>, vector<1x128xf32>
    %4 = vector.broadcast %3 : vector<1x128xf32> to vector<8x128xf32>
    %5 = arith.addf %2, %4 : vector<8x128xf32>
    %cst_5 = arith.constant 0.000000e+00 : f32
    %6 = vector.broadcast %cst_5 : f32 to vector<8x128xf32>
    %7 = arith.maximumf %5, %6 : vector<8x128xf32>
    %c0_6 = arith.constant 0 : index
    %c0_7 = arith.constant 0 : index
    %8 = vector.load %arg2[%c0_6, %c0_7] : memref<128x128xf32, #tpu.memory_space<vmem>>, vector<128x128xf32>
    %cst_8 = arith.constant dense<0.000000e+00> : vector<8x128xf32>
    %9 = tpu.matmul %7, %8, %cst_8 {dimension_numbers = #tpu.dot_dimension_numbers<[1], [0], [0], [1], [0, 0, 1, 1], [], []>} : vector<8x128xf32>, vector<128x128xf32>, vector<8x128xf32> -> vector<8x128xf32>
    %c1 = arith.constant 1 : index
    %c0_9 = arith.constant 0 : index
    %10 = vector.load %arg3[%c1, %c0_9] : memref<2x128xf32, #tpu.memory_space<vmem>>, vector<1x128xf32>
    %11 = vector.broadcast %10 : vector<1x128xf32> to vector<8x128xf32>
    %12 = arith.addf %9, %11 : vector<8x128xf32>
    %c0_10 = arith.constant 0 : index
    %c0_11 = arith.constant 0 : index
    %13 = vector.load %arg4[%c0_10, %c0_11] : memref<8x128xf32, #tpu.memory_space<vmem>>, vector<8x128xf32>
    tpu.vector_store %arg4[%c0_10, %c0_11], %12 {strides = array<i32>} : memref<8x128xf32, #tpu.memory_space<vmem>>, vector<8x128xf32>,
    return
  }
}

</mosaic_0001>

<bundles_post_ra>
// kernel: tpu_custom_call.1
= control target key start
LH: loop header
LB: loop body
LE: loop exit
PB: predicated region body
PF: predicated region fallthrough
CT: control target
= control target key end

     0   :  { %9 = vsyncpa [#allocation3], 0  ;;  %s545_s0 = inlined_call_operand.hbm [shape: f32[8,11], index: 0, kind: input, shape index: {}]   ;;  %s546_s1 = inlined_call_operand.hbm [shape: f32[11,128], index: 1, kind: input, shape index: {}]   ;;  %s547_s2 = inlined_call_operand.hbm [shape: f32[128,128], index: 2, kind: input, shape index: {}]   ;;  %s548_s3 = inlined_call_operand.vmem [shape: f32[2,128], index: 3, kind: input, shape index: {}]   ;;  %s549_s4 = inlined_call_operand.hbm [shape: f32[8,128], index: 4, kind: output, shape index: {}]  }
   0x1   :  { %10 = vsyncpa [#allocation6], 0 }
   0x2   :  { %11 = vsyncpa [#allocation4], 0  ;;  %s450_s15 = smov [#allocation5]   ;;  %s356_s19 = scalar_lea.hbm %s546_s1, 256 }
   0x3   :  { %s27_s16 = sshll.u32 %s450_s15, 4  ;;  %p357_p0 = scmp.ne.s32.totalorder %s546_s1, %s356_s19  ;;  %s28_s16 = int_to_ptr.vmem [resolvable:$true] %s27_s16 }
   0x4   :  { %p360_p1 = scmp.lt.u32.totalorder %s356_s19, %s546_s1 }
   0x6   :  { %p362_p2 = pnand %p360_p1, %p357_p0 }
   0x8   :  { %365 = shalt.err (!%p362_p2)
}
   0x9   :  { %s366_s24 = scalar_lea.vmem %s28_s16, 256  ;;  %p371_p4 = scmp.lt.s32.totalorder %s28_s16, %s28_s16 }
   0xa   :  { %p367_p3 = scmp.ne.s32.totalorder %s28_s16, %s366_s24  ;;  %p372_p5 = scmp.lt.s32.totalorder %s366_s24, %s366_s24 }
   0xc   :  { %p373_p6 = por %p372_p5, %p371_p4 }
   0xe   :  { %p374_p7 = pnand %p373_p6, %p367_p3 }
  0x10   :  { %377 = shalt.err (!%p374_p7)
}
  0x11   :  { %s451_s25 = smov 128   ;;  %s452_s26 = smov 8  }
  0x12   :  { %33 = dma.hbm_to_vmem [thread:$0]  %s546_s1, 256, %s28_s16, [#allocation6], %s451_s25, %s451_s25, %s452_s26  }
  0x13   :  { %s453_s29 = smov [#allocation2]   ;;  %s454_s5 = smov [#allocation7]  }
  0x14   :  { %s18_s30 = sshll.u32 %s453_s29, 4  ;;  %s39_s6 = sshll.u32 %s454_s5, 4  ;;  %s19_s30 = int_to_ptr.vmem [resolvable:$true] %s18_s30  ;;  %s40_s6 = int_to_ptr.vmem [resolvable:$true] %s39_s6 }
  0x15   :  { %s378_s9 = scalar_lea.hbm %s545_s0, 128 }
  0x16   :  { %p379_p8 = scmp.ne.s32.totalorder %s545_s0, %s378_s9  ;;  %p382_p9 = scmp.lt.u32.totalorder %s378_s9, %s545_s0 }
  0x18   :  { %p384_p10 = pnand %p382_p9, %p379_p8 }
  0x1a   :  { %387 = shalt.err (!%p384_p10)
}
  0x1b   :  { %s388_s1 = scalar_lea.vmem %s19_s30, 128  ;;  %p393_p12 = scmp.lt.s32.totalorder %s19_s30, %s19_s30 }
  0x1c   :  { %p389_p11 = scmp.ne.s32.totalorder %s19_s30, %s388_s1  ;;  %p394_p13 = scmp.lt.s32.totalorder %s388_s1, %s388_s1 }
  0x1e   :  { %p395_p0 = por %p394_p13, %p393_p12 }
  0x20   :  { %p396_p1 = pnand %p395_p0, %p389_p11 }
  0x22   :  { %399 = shalt.err (!%p396_p1)
}
  0x23   :  { %21 = dma.hbm_to_vmem [thread:$0]  %s545_s0, 128, %s19_s30, [#allocation3]  }
  0x24   :  { %s400_s18 = scalar_lea.hbm %s547_s2, 2048 }
  0x25   :  { %p401_p2 = scmp.ne.s32.totalorder %s547_s2, %s400_s18  ;;  %p404_p3 = scmp.lt.u32.totalorder %s400_s18, %s547_s2 }
  0x27   :  { %p406_p4 = pnand %p404_p3, %p401_p2 }
  0x29   :  { %409 = shalt.err (!%p406_p4)
}
  0x2a   :  { %s410_s23 = scalar_lea.vmem %s40_s6, 2048  ;;  %p415_p6 = scmp.lt.s32.totalorder %s40_s6, %s40_s6 }
  0x2b   :  { %p411_p5 = scmp.ne.s32.totalorder %s40_s6, %s410_s23  ;;  %p416_p7 = scmp.lt.s32.totalorder %s410_s23, %s410_s23 }
  0x2d   :  { %p417_p8 = por %p416_p7, %p415_p6 }
  0x2f   :  { %p418_p9 = pnand %p417_p8, %p411_p5 }
  0x31   :  { %421 = shalt.err (!%p418_p9)
}
  0x32   :  { %45 = dma.hbm_to_vmem [thread:$0]  %s547_s2, 2048, %s40_s6, [#allocation6], %s451_s25, %s451_s25, %s452_s26  }
  0x33   :  { %444 = dma.done.wait [#allocation3], 128  }
  0x34   :  { %445 = vsyncadd [#allocation3], 4294967168 }
  0x35   :  { %446 = dma.done.wait [#allocation6], 2304  }
  0x36   :  { %447 = vsyncadd [#allocation6], 4294964992  ;;  %v455_v0 = vmov 0.0|0.0   ;;  %vm456_vm0 = vmmov 0   ;;  %v457_v1 = vmov 0.0   ;;  %vm69_vm1 = vcmask 1042432  }
  0x37   :  { %318 = vmatprep.subr.bf16.mxu0 %v455_v0  ;;  %322 = vmatprep.subr.bf16.mxu1 %v455_v0  ;;  %v58_v2 = vld [vmem:[#allocation5] sm:$0xff]  ;;  %v59_v3 = vld [vmem:[#allocation5 + $0x8] sm:$0x7]  ;;  %vm458_vm2 = vmmov 1   ;;  %v144_v5 = vld [vmem:[#allocation7] sm:$0xff]  ;;  %vm65_vm4 = vcmask 89088  }
  0x38   :  { %280 = vmatprep.mubr.msk.f32.mxu0 %vm456_vm0, %v457_v1  ;;  %315 = vmatprep.mubr.msk.f32.mxu1 %vm456_vm0, %v457_v1  ;;  %vm320_vm3 = vmpackc.low %vm69_vm1, %vm458_vm2  ;;  %v319_v4 = vpack.c.bf16 %v59_v3, %v58_v2  ;;  %v145_v6 = vld [vmem:[#allocation7 + $0x8] sm:$0xff]  ;;  %v146_v7 = vld [vmem:[#allocation7 + $0x10] sm:$0xff]  ;;  %s459_s28 = smov [#allocation8]  }
  0x39   :  { %v323_v8 = vpack.c.bf16 %v145_v6, %v144_v5  ;;  %v147_v9 = vld [vmem:[#allocation7 + $0x18] sm:$0xff]  ;;  %v57_v10 = vld [vmem:[#allocation2] sm:$0xff]  ;;  %v148_v12 = vld [vmem:[#allocation7 + $0x20] sm:$0xff]  ;;  %s242_s29 = sshll.u32 %s459_s28, 4  ;;  %s243_s29 = int_to_ptr.vmem [resolvable:$true] %s242_s29 }
  0x3a   :  { %321 = vmatpush3.bf16.msk.msra.mxu0 %vm320_vm3, %v319_v4  ;;  %v326_v11 = vpack.c.bf16 %v147_v9, %v146_v7  ;;  %v149_v13 = vld [vmem:[#allocation7 + $0x28] sm:$0xff]  ;;  %v150_v15 = vld [vmem:[#allocation7 + $0x30] sm:$0xff]  ;;  %v151_v16 = vld [vmem:[#allocation7 + $0x38] sm:$0xff]  ;;  %s422_s30 = scalar_lea.vmem %s243_s29, 128  ;;  %p427_p11 = scmp.lt.s32.totalorder %s243_s29, %s243_s29 }
  0x3b   :  { %324 = vmatpush3.bf16.msra.mxu1 %v323_v8  ;;  %v329_v14 = vpack.c.bf16 %v149_v13, %v148_v12  ;;  %v332_v17 = vpack.c.bf16 %v151_v16, %v150_v15  ;;  %v152_v18 = vld [vmem:[#allocation7 + $0x40] sm:$0xff]  ;;  %v153_v19 = vld [vmem:[#allocation7 + $0x48] sm:$0xff]  ;;  %v154_v21 = vld [vmem:[#allocation7 + $0x50] sm:$0xff]  ;;  %p423_p10 = scmp.ne.s32.totalorder %s243_s29, %s422_s30  ;;  %p428_p12 = scmp.lt.s32.totalorder %s422_s30, %s422_s30 }
  0x3c   :  { %325 = vmatprep.subr.bf16.mxu1 %v455_v0  ;;  %v335_v20 = vpack.c.bf16 %v153_v19, %v152_v18  ;;  %v155_v22 = vld [vmem:[#allocation7 + $0x58] sm:$0xff]  ;;  %v156_v24 = vld [vmem:[#allocation7 + $0x60] sm:$0xff]  ;;  %v157_v25 = vld [vmem:[#allocation7 + $0x68] sm:$0xff] }
  0x3d   :  { %281 = vmatmul.mubr.msk.f32.vlgmr.msra.gmra.mrb[0].mxu0 %vm65_vm4, %v57_v10  ;;  %v338_v23 = vpack.c.bf16 %v155_v22, %v154_v21  ;;  %v341_v26 = vpack.c.bf16 %v157_v25, %v156_v24  ;;  %v158_v27 = vld [vmem:[#allocation7 + $0x70] sm:$0xff]  ;;  %v159_v28 = vld [vmem:[#allocation7 + $0x78] sm:$0xff]  ;;  %v252_v30 = vld [vmem:[%s548_s3] ss:$0 sm:$0xff]  ;;  %p429_p13 = por %p428_p12, %p427_p11 }
  0x3e   :  { %v344_v29 = vpack.c.bf16 %v159_v28, %v158_v27  ;;  %v255_v35 = vld [vmem:[%s548_s3 + $0x1] ss:$0 sm:$0xff] }
  0x3f   :  { %327 = vmatpush3.bf16.msra.mxu1 %v326_v11  ;;  %p430_p0 = pnand %p429_p13, %p423_p10 }
  0x40   :  { %328 = vmatprep.subr.bf16.mxu1 %v455_v0 }
  0x43   :  { %330 = vmatpush3.bf16.msra.mxu1 %v329_v14 }
  0x44   :  { %331 = vmatprep.subr.bf16.mxu1 %v455_v0 }
  0x47   :  { %333 = vmatpush3.bf16.msra.mxu1 %v332_v17 }
  0x48   :  { %334 = vmatprep.subr.bf16.mxu1 %v455_v0 }
  0x4b   :  { %336 = vmatpush3.bf16.msra.mxu1 %v335_v20 }
  0x4c   :  { %337 = vmatprep.subr.bf16.mxu1 %v455_v0 }
  0x4f   :  { %339 = vmatpush3.bf16.msra.mxu1 %v338_v23 }
  0x50   :  { %340 = vmatprep.subr.bf16.mxu1 %v455_v0 }
  0x53   :  { %342 = vmatpush3.bf16.msra.mxu1 %v341_v26 }
  0x54   :  { %343 = vmatprep.subr.bf16.mxu1 %v455_v0 }
  0x57   :  { %345 = vmatpush3.bf16.msra.mxu1 %v344_v29 }
 0x110   :  { %v139_v31 = vpop.f32.mrb[0].mxu0 }
 0x111   :  { %v140_v32 = vadd.f32 %v252_v30, %v139_v31  ;;  %v282_v33 = vpop.f32.mrb[1].mxu0 }
 0x113   :  { %v143_v34 = vmax.f32 %v140_v32, 0.0 }
 0x115   :  { %316 = vmatmul.mubr.f32.vlgmr.msra.gmra.mrb[0].mxu1 %v143_v34 }
 0x1e8   :  { %v231_v36 = vpop.f32.mrb[0].mxu1 }
 0x1e9   :  { %v232_v37 = vadd.f32 %v255_v35, %v231_v36  ;;  %v317_v38 = vpop.f32.mrb[1].mxu1 }
 0x1eb   :  { %235 = vst [vmem:[#allocation8] sm:$0xff] %v232_v37 }
 0x1ec   :  { %433 = shalt.err (!%p430_p0)
}
 0x1ed   :  { %s434_s7 = scalar_lea.hbm %s549_s4, 128 }
 0x1ee   :  { %p435_p1 = scmp.ne.s32.totalorder %s549_s4, %s434_s7  ;;  %p438_p2 = scmp.lt.u32.totalorder %s434_s7, %s549_s4 }
 0x1f0   :  { %p440_p3 = pnand %p438_p2, %p435_p1 }
 0x1f2   :  { %443 = shalt.err (!%p440_p3)
}
 0x1f3   :  { %245 = dma.vmem_to_hbm [thread:$0]  %s243_s29, 128, %s549_s4, [#allocation4]  }
 0x1f4   :  { %448 = dma.done.wait [#allocation4], 128  }
 0x1f5   :  { %449 = vsyncadd [#allocation4], 4294967168 }
 0x1f6   :  { %249 = vsyncpa [#allocation3], 1 }
 0x1f7   :  { %250 = vsyncpa [#allocation6], 1 }
 0x1f8   :  { %251 = vsyncpa [#allocation4], 1 }

</bundles_post_ra>
